<compile_context>
chip_gen: v6e
topology: v6e:2x2x1
jax: 0.10.0
libtpu: 0.0.40
codegen_flags: <defaults>
</compile_context>

<pallas_src>
import jax
import jax.numpy as jnp
from jax.experimental import pallas as pl
from jax.experimental.pallas import tpu as pltpu


NEG_SLOPE = 0.01  # torch.nn.LeakyReLU default


def _round_up(x, m):
    return (x + m - 1) // m * m


def _leaky_relu(x):
    return jnp.where(x > 0, x, NEG_SLOPE * x)


# ---------------------------------------------------------------------------
# Kernel
# ---------------------------------------------------------------------------
def feedforward_kernel(x_ref, w1_ref, b1_ref, w2_ref, b2_ref, o_ref):
    # x_ref : (TM, H_pad)        compute dtype (bf16)
    # w1_ref: (H_pad, Hm_pad)    compute dtype (bf16)
    # b1_ref: (1, Hm_pad)        f32
    # w2_ref: (Hm_pad, H_pad)    compute dtype (bf16)
    # b2_ref: (1, H_pad)         f32
    # o_ref : (TM, H_pad)        output dtype
    x = x_ref[...]

    # FF_1: (TM,H) @ (H,Hm) on the MXU, f32 accumulate; bias + act in f32.
    h = jnp.dot(x, w1_ref[...], preferred_element_type=jnp.float32)
    h = _leaky_relu(h + b1_ref[...])

    # dropout: identity (eval mode)

    # FF_2
    y = jnp.dot(h.astype(w2_ref.dtype), w2_ref[...],
                preferred_element_type=jnp.float32)
    y = _leaky_relu(y + b2_ref[...])

    o_ref[...] = y.astype(o_ref.dtype)


# ---------------------------------------------------------------------------
# Parameter preparation (one-time, off the hot path)
# ---------------------------------------------------------------------------
def prepare_feedforward_params(w1, b1, w2, b2, compute_dtype=jnp.bfloat16):
    """Convert PyTorch-layout Linear params (w: (out,in), b: (out,)) into
    padded, pre-transposed, compute-dtype kernel params. Do this ONCE at init.
    """
    hm, hidden = w1.shape
    h_pad = _round_up(hidden, 128)
    hm_pad = _round_up(hm, 128)

    w1_t = jnp.zeros((h_pad, hm_pad), compute_dtype)
    w1_t = w1_t.at[:hidden, :hm].set(w1.T.astype(compute_dtype))
    w2_t = jnp.zeros((hm_pad, h_pad), compute_dtype)
    w2_t = w2_t.at[:hm, :hidden].set(w2.T.astype(compute_dtype))

    # Biases kept in f32 (tiny) so they are added at full precision.
    b1_p = jnp.zeros((1, hm_pad), jnp.float32).at[0, :hm].set(b1.astype(jnp.float32))
    b2_p = jnp.zeros((1, h_pad), jnp.float32).at[0, :hidden].set(b2.astype(jnp.float32))

    return dict(w1_t=w1_t, b1=b1_p, w2_t=w2_t, b2=b2_p,
                hidden=int(hidden), hm=int(hm),
                h_pad=int(h_pad), hm_pad=int(hm_pad),
                compute_dtype=compute_dtype)


def _pick_tm(m, h_pad, hm_pad, out_itemsize, cdt_itemsize,
             budget_bytes=12 * 1024 * 1024, tm_cap=512):
    """Largest M-tile (multiple of 8, capped) whose working set fits a
    conservative VMEM budget, accounting for 2x double-buffering."""
    # Resident regardless of TM: both weight matrices (2x buffered) + biases.
    fixed = 2 * 2 * h_pad * hm_pad * cdt_itemsize + 2 * (hm_pad + h_pad) * 4
    # Per output row: x tile (2x buf), out tile (2x buf), f32 h + bf16 h copy.
    per_row = (2 * h_pad * cdt_itemsize
               + 2 * h_pad * out_itemsize
               + hm_pad * 4 + hm_pad * cdt_itemsize)
    avail = max(budget_bytes - fixed, per_row * 8)
    tm = max(8, (int(avail // per_row) // 8) * 8)
    tm = min(tm, tm_cap, _round_up(m, 8))
    return tm


# ---------------------------------------------------------------------------
# Wrapper
# ---------------------------------------------------------------------------
def feedforward_pallas(x, params):
    """x: (..., hidden). params: output of prepare_feedforward_params."""
    orig_shape = x.shape
    hidden = params["hidden"]
    assert orig_shape[-1] == hidden
    h_pad, hm_pad = params["h_pad"], params["hm_pad"]
    cdt = params["compute_dtype"]
    out_dtype = x.dtype

    x2d = x.reshape(-1, hidden)
    m = x2d.shape[0]

    tm = _pick_tm(m, h_pad, hm_pad,
                  jnp.dtype(out_dtype).itemsize, jnp.dtype(cdt).itemsize)
    m_pad = _round_up(m, tm)
    n_m = m_pad // tm

    # Pad to lane-dense shape and cast to the MXU compute dtype.
    x_p = jnp.zeros((m_pad, h_pad), cdt).at[:m, :hidden].set(x2d.astype(cdt))

    flops = 2 * 2 * m_pad * h_pad * hm_pad  # two matmuls
    bytes_accessed = (m_pad * h_pad * jnp.dtype(cdt).itemsize        # x in
                      + 2 * h_pad * hm_pad * jnp.dtype(cdt).itemsize  # weights
                      + (hm_pad + h_pad) * 4                          # biases
                      + m_pad * h_pad * jnp.dtype(out_dtype).itemsize)  # out

    out = pl.pallas_call(
        feedforward_kernel,
        out_shape=jax.ShapeDtypeStruct((m_pad, h_pad), out_dtype),
        grid_spec=pltpu.PrefetchScalarGridSpec(
            num_scalar_prefetch=0,
            grid=(n_m,),
            in_specs=[
                pl.BlockSpec((tm, h_pad), lambda i: (i, 0)),      # x tile
                pl.BlockSpec((h_pad, hm_pad), lambda i: (0, 0)),  # W1^T (const)
                pl.BlockSpec((1, hm_pad), lambda i: (0, 0)),      # b1
                pl.BlockSpec((hm_pad, h_pad), lambda i: (0, 0)),  # W2^T (const)
                pl.BlockSpec((1, h_pad), lambda i: (0, 0)),       # b2
            ],
            out_specs=pl.BlockSpec((tm, h_pad), lambda i: (i, 0)),
        ),
        compiler_params=pltpu.CompilerParams(
            dimension_semantics=("parallel",)),  # megacore split on v7x
        cost_estimate=pl.CostEstimate(
            flops=int(flops), transcendentals=0,
            bytes_accessed=int(bytes_accessed)),
    )(x_p, params["w1_t"], params["b1"], params["w2_t"], params["b2"])

    return out[:m, :hidden].reshape(orig_shape)


# ---------------------------------------------------------------------------
# Reference + init (for the self-test)
# ---------------------------------------------------------------------------
def init_feedforward_params(key, hidden, multi=1, dtype=jnp.float32):
    """Mimics torch.nn.Linear default init U(-1/sqrt(fan_in), 1/sqrt(fan_in))."""
    hm = hidden * multi
    k1, k2, k3, k4 = jax.random.split(key, 4)
    bound1 = 1.0 / (hidden ** 0.5)
    bound2 = 1.0 / (hm ** 0.5)
    w1 = jax.random.uniform(k1, (hm, hidden), dtype, -bound1, bound1)
    b1 = jax.random.uniform(k2, (hm,), dtype, -bound1, bound1)
    w2 = jax.random.uniform(k3, (hidden, hm), dtype, -bound2, bound2)
    b2 = jax.random.uniform(k4, (hidden,), dtype, -bound2, bound2)
    return w1, b1, w2, b2


def feedforward_ref(x, w1, b1, w2, b2):
    # pure-JAX f32 reference matching the PyTorch forward (eval mode)
    h = _leaky_relu(x @ w1.T + b1)
    y = _leaky_relu(h @ w2.T + b2)
    return y


if __name__ == "__main__":
    key = jax.random.PRNGKey(0)
    kx, kp = jax.random.split(key)

    batch, seq, hidden, multi = 2, 8, 32, 1
    x = jax.random.normal(kx, (batch, seq, hidden), jnp.float32)
    w1, b1, w2, b2 = init_feedforward_params(kp, hidden, multi)

    params = prepare_feedforward_params(w1, b1, w2, b2)  # one-time prep

    out = feedforward_pallas(x, params)
    out = jax.block_until_ready(out)

    ref = feedforward_ref(x, w1, b1, w2, b2)
    assert out.shape == x.shape
    max_err = float(jnp.max(jnp.abs(out - ref)))
    # bf16 MXU path vs f32 reference -> relaxed tolerance.
    assert jnp.allclose(out, ref, atol=5e-2, rtol=5e-2), \
        f"mismatch vs reference, max abs err = {max_err}"

    print("KERNEL_OK")
</pallas_src>

<mosaic_0001>
module attributes {stable_mosaic.version = 11 : i64} {
  func.func @feedforward_kernel(%arg0: i32, %arg1: memref<16x128xbf16, #tpu.memory_space<vmem>>, %arg2: memref<128x128xbf16, #tpu.memory_space<vmem>>, %arg3: memref<1x128xf32, #tpu.memory_space<vmem>>, %arg4: memref<128x128xbf16, #tpu.memory_space<vmem>>, %arg5: memref<1x128xf32, #tpu.memory_space<vmem>>, %arg6: memref<16x128xf32, #tpu.memory_space<vmem>>) attributes {dimension_semantics = [#tpu.dimension_semantics<parallel>], iteration_bounds = array<i64: 1>, scalar_prefetch = 0 : i64, scratch_operands = 0 : i64, tpu.core_type = #tpu.core_type<tc>, window_params = [{transform_indices = @transform_0, window_bounds = array<i64: 16, 128>}, {pipeline_mode = #tpu.pipeline_mode<synchronous>, transform_indices = @transform_1, window_bounds = array<i64: 128, 128>}, {pipeline_mode = #tpu.pipeline_mode<synchronous>, transform_indices = @transform_2, window_bounds = array<i64: 1, 128>}, {pipeline_mode = #tpu.pipeline_mode<synchronous>, transform_indices = @transform_3, window_bounds = array<i64: 128, 128>}, {pipeline_mode = #tpu.pipeline_mode<synchronous>, transform_indices = @transform_4, window_bounds = array<i64: 1, 128>}, {transform_indices = @transform_5, window_bounds = array<i64: 16, 128>}]} {
    %c0 = arith.constant 0 : index
    %c0_0 = arith.constant 0 : index
    %0 = vector.load %arg1[%c0, %c0_0] : memref<16x128xbf16, #tpu.memory_space<vmem>>, vector<16x128xbf16>
    %c0_1 = arith.constant 0 : index
    %c0_2 = arith.constant 0 : index
    %1 = vector.load %arg2[%c0_1, %c0_2] : memref<128x128xbf16, #tpu.memory_space<vmem>>, vector<128x128xbf16>
    %cst = arith.constant dense<0.000000e+00> : vector<16x128xf32>
    %2 = tpu.matmul %0, %1, %cst {dimension_numbers = #tpu.dot_dimension_numbers<[1], [0], [0], [1], [0, 0, 1, 1], [], []>} : vector<16x128xbf16>, vector<128x128xbf16>, vector<16x128xf32> -> vector<16x128xf32>
    %c0_3 = arith.constant 0 : index
    %c0_4 = arith.constant 0 : index
    %3 = vector.load %arg3[%c0_3, %c0_4] : memref<1x128xf32, #tpu.memory_space<vmem>>, vector<1x128xf32>
    %4 = vector.broadcast %3 : vector<1x128xf32> to vector<16x128xf32>
    %5 = arith.addf %2, %4 : vector<16x128xf32>
    %cst_5 = arith.constant 0.000000e+00 : f32
    %6 = vector.broadcast %cst_5 : f32 to vector<16x128xf32>
    %7 = arith.cmpf ogt, %5, %6 : vector<16x128xf32>
    %cst_6 = arith.constant 0.00999999977 : f32
    %8 = vector.broadcast %cst_6 : f32 to vector<16x128xf32>
    %9 = arith.mulf %8, %5 : vector<16x128xf32>
    %10 = arith.select %7, %5, %9 : vector<16x128xi1>, vector<16x128xf32>
    %11 = arith.truncf %10 : vector<16x128xf32> to vector<16x128xbf16>
    %c0_7 = arith.constant 0 : index
    %c0_8 = arith.constant 0 : index
    %12 = vector.load %arg4[%c0_7, %c0_8] : memref<128x128xbf16, #tpu.memory_space<vmem>>, vector<128x128xbf16>
    %cst_9 = arith.constant dense<0.000000e+00> : vector<16x128xf32>
    %13 = tpu.matmul %11, %12, %cst_9 {dimension_numbers = #tpu.dot_dimension_numbers<[1], [0], [0], [1], [0, 0, 1, 1], [], []>} : vector<16x128xbf16>, vector<128x128xbf16>, vector<16x128xf32> -> vector<16x128xf32>
    %c0_10 = arith.constant 0 : index
    %c0_11 = arith.constant 0 : index
    %14 = vector.load %arg5[%c0_10, %c0_11] : memref<1x128xf32, #tpu.memory_space<vmem>>, vector<1x128xf32>
    %15 = vector.broadcast %14 : vector<1x128xf32> to vector<16x128xf32>
    %16 = arith.addf %13, %15 : vector<16x128xf32>
    %cst_12 = arith.constant 0.000000e+00 : f32
    %17 = vector.broadcast %cst_12 : f32 to vector<16x128xf32>
    %18 = arith.cmpf ogt, %16, %17 : vector<16x128xf32>
    %cst_13 = arith.constant 0.00999999977 : f32
    %19 = vector.broadcast %cst_13 : f32 to vector<16x128xf32>
    %20 = arith.mulf %19, %16 : vector<16x128xf32>
    %21 = arith.select %18, %16, %20 : vector<16x128xi1>, vector<16x128xf32>
    %c0_14 = arith.constant 0 : index
    %c0_15 = arith.constant 0 : index
    %22 = vector.load %arg6[%c0_14, %c0_15] : memref<16x128xf32, #tpu.memory_space<vmem>>, vector<16x128xf32>
    tpu.vector_store %arg6[%c0_14, %c0_15], %21 {strides = array<i32>} : memref<16x128xf32, #tpu.memory_space<vmem>>, vector<16x128xf32>,
    return
  }
  func.func @transform_0(%arg0: i32) -> (i32, i32) {
    %c0_i32 = arith.constant 0 : i32
    %c0_i32_0 = arith.constant 0 : i32
    return %arg0, %c0_i32 : i32, i32
  }
  func.func @transform_1(%arg0: i32) -> (i32, i32) {
    %c0_i32 = arith.constant 0 : i32
    %c0_i32_0 = arith.constant 0 : i32
    %c0_i32_1 = arith.constant 0 : i32
    return %c0_i32, %c0_i32_0 : i32, i32
  }
  func.func @transform_2(%arg0: i32) -> (i32, i32) {
    %c0_i32 = arith.constant 0 : i32
    %c0_i32_0 = arith.constant 0 : i32
    %c0_i32_1 = arith.constant 0 : i32
    return %c0_i32, %c0_i32_0 : i32, i32
  }
  func.func @transform_3(%arg0: i32) -> (i32, i32) {
    %c0_i32 = arith.constant 0 : i32
    %c0_i32_0 = arith.constant 0 : i32
    %c0_i32_1 = arith.constant 0 : i32
    return %c0_i32, %c0_i32_0 : i32, i32
  }
  func.func @transform_4(%arg0: i32) -> (i32, i32) {
    %c0_i32 = arith.constant 0 : i32
    %c0_i32_0 = arith.constant 0 : i32
    %c0_i32_1 = arith.constant 0 : i32
    return %c0_i32, %c0_i32_0 : i32, i32
  }
  func.func @transform_5(%arg0: i32) -> (i32, i32) {
    %c0_i32 = arith.constant 0 : i32
    %c0_i32_0 = arith.constant 0 : i32
    return %arg0, %c0_i32 : i32, i32
  }
}

</mosaic_0001>

<bundles_post_ra>
// kernel: tpu_custom_call.1
= control target key start
LH: loop header
LB: loop body
LE: loop exit
PB: predicated region body
PF: predicated region fallthrough
CT: control target
= control target key end

     0   :  { %10 = vsyncpa [#allocation3], 0  ;;  %s576_s0 = inlined_call_operand.hbm [shape: bf16[16,128], index: 0, kind: input, shape index: {}]   ;;  %s577_s1 = inlined_call_operand.hbm [shape: bf16[128,128], index: 1, kind: input, shape index: {}]   ;;  %s578_s2 = inlined_call_operand.vmem [shape: f32[1,128], index: 2, kind: input, shape index: {}]   ;;  %s579_s3 = inlined_call_operand.hbm [shape: bf16[128,128], index: 3, kind: input, shape index: {}]   ;;  %s580_s4 = inlined_call_operand.vmem [shape: f32[1,128], index: 4, kind: input, shape index: {}]   ;;  %s581_s5 = inlined_call_operand.hbm [shape: f32[16,128], index: 5, kind: output, shape index: {}]  }
   0x1   :  { %11 = vsyncpa [#allocation6], 0 }
   0x2   :  { %12 = vsyncpa [#allocation4], 0  ;;  %s518_s18 = smov [#allocation5]   ;;  %s519_s20 = smov [#allocation2]  }
   0x3   :  { %s30_s19 = sshll.u32 %s518_s18, 4  ;;  %s18_s21 = sshll.u32 %s519_s20, 4  ;;  %s31_s19 = int_to_ptr.vmem [resolvable:$true] %s30_s19  ;;  %s19_s21 = int_to_ptr.vmem [resolvable:$true] %s18_s21 }
   0x4   :  { %s440_s22 = scalar_lea.vmem %s31_s19, 1024  ;;  %p445_p1 = scmp.lt.s32.totalorder %s31_s19, %s31_s19 }
   0x5   :  { %p441_p0 = scmp.ne.s32.totalorder %s31_s19, %s440_s22  ;;  %p446_p2 = scmp.lt.s32.totalorder %s440_s22, %s440_s22 }
   0x7   :  { %p447_p3 = por %p446_p2, %p445_p1 }
   0x9   :  { %p448_p4 = pnand %p447_p3, %p441_p0 }
   0xb   :  { %451 = shalt.err (!%p448_p4)
}
   0xc   :  { %s520_s23 = smov 64   ;;  %s521_s24 = smov 4  }
   0xd   :  { %36 = dma.hbm_to_vmem [thread:$0]  %s577_s1, 1024, %s31_s19, [#allocation6], %s520_s23, %s520_s23, %s521_s24  }
   0xe   :  { %s460_s27 = scalar_lea.vmem %s19_s21, 128  ;;  %p465_p6 = scmp.lt.s32.totalorder %s19_s21, %s19_s21 }
   0xf   :  { %p461_p5 = scmp.ne.s32.totalorder %s19_s21, %s460_s27  ;;  %p466_p7 = scmp.lt.s32.totalorder %s460_s27, %s460_s27 }
  0x11   :  { %p467_p8 = por %p466_p7, %p465_p6 }
  0x13   :  { %p468_p9 = pnand %p467_p8, %p461_p5 }
  0x15   :  { %471 = shalt.err (!%p468_p9)
}
  0x16   :  { %24 = dma.hbm_to_vmem [thread:$0]  %s576_s0, 128, %s19_s21, [#allocation3], %s520_s23, %s520_s23, %s521_s24  }
  0x17   :  { %s522_s30 = smov [#allocation7]  }
  0x18   :  { %s44_s6 = sshll.u32 %s522_s30, 4  ;;  %s45_s6 = int_to_ptr.vmem [resolvable:$true] %s44_s6 }
  0x19   :  { %s480_s7 = scalar_lea.vmem %s45_s6, 1024  ;;  %p485_p11 = scmp.lt.s32.totalorder %s45_s6, %s45_s6 }
  0x1a   :  { %p481_p10 = scmp.ne.s32.totalorder %s45_s6, %s480_s7  ;;  %p486_p12 = scmp.lt.s32.totalorder %s480_s7, %s480_s7 }
  0x1c   :  { %p487_p13 = por %p486_p12, %p485_p11 }
  0x1e   :  { %p488_p0 = pnand %p487_p13, %p481_p10 }
  0x20   :  { %491 = shalt.err (!%p488_p0)
}
  0x21   :  { %50 = dma.hbm_to_vmem [thread:$0]  %s579_s3, 1024, %s45_s6, [#allocation6], %s520_s23, %s520_s23, %s521_s24  }
  0x22   :  { %512 = dma.done.wait [#allocation3], 128  }
  0x23   :  { %513 = vsyncadd [#allocation3], 4294967168 }
  0x24   :  { %514 = dma.done.wait [#allocation6], 2048  }
  0x25   :  { %515 = vsyncadd [#allocation6], 4294965248  ;;  %v523_v0 = vmov 0.0   ;;  %vm524_vm0 = vmmov 0   ;;  %v415_v1 = vld [vmem:[#allocation5 + $0x38] sm:$0xff]   ;;  %v416_v2 = vld [vmem:[#allocation5 + $0x30] sm:$0xff]  }
  0x26   :  { %365 = vmatprep.subr.bf16.mxu0 %v523_v0  ;;  %381 = vmatprep.mubr.msk.bf16.mxu0 %vm524_vm0, %v523_v0  ;;  %v417_v3 = vld [vmem:[#allocation5 + $0x28] sm:$0xff]   ;;  %v424_v4 = vld [vmem:[#allocation7 + $0x38] sm:$0xff]   ;;  %v418_v5 = vld [vmem:[#allocation5 + $0x20] sm:$0xff]  }
  0x27   :  { %385 = vmatprep.subr.bf16.mxu1 %v523_v0  ;;  %401 = vmatprep.mubr.msk.bf16.mxu1 %vm524_vm0, %v523_v0  ;;  %v425_v6 = vld [vmem:[#allocation7 + $0x30] sm:$0xff]   ;;  %v419_v7 = vld [vmem:[#allocation5 + $0x18] sm:$0xff]   ;;  %v426_v8 = vld [vmem:[#allocation7 + $0x28] sm:$0xff]  }
  0x28   :  { %366 = vmatpush3.bf16.msra.mxu0 %v415_v1  ;;  %386 = vmatpush3.bf16.msra.mxu1 %v424_v4  ;;  %v420_v9 = vld [vmem:[#allocation5 + $0x10] sm:$0xff]   ;;  %v427_v10 = vld [vmem:[#allocation7 + $0x20] sm:$0xff]   ;;  %v421_v11 = vld [vmem:[#allocation5 + $0x8] sm:$0xff]  }
  0x29   :  { %367 = vmatprep.subr.bf16.mxu0 %v523_v0  ;;  %387 = vmatprep.subr.bf16.mxu1 %v523_v0  ;;  %v428_v12 = vld [vmem:[#allocation7 + $0x18] sm:$0xff]   ;;  %v422_v13 = vld [vmem:[#allocation5] sm:$0xff]   ;;  %v429_v15 = vld [vmem:[#allocation7 + $0x10] sm:$0xff]  }
  0x2a   :  { %v423_v14 = vld [vmem:[#allocation2] sm:$0xff]   ;;  %v430_v16 = vld [vmem:[#allocation7 + $0x8] sm:$0xff]   ;;  %v431_v17 = vld [vmem:[#allocation7] sm:$0xff]  }
  0x2b   :  { %v328_v18 = vld [vmem:[%s578_s2] ss:$0 sm:$0xff]  ;;  %s525_s2 = smov [#allocation8]  }
  0x2c   :  { %368 = vmatpush3.bf16.msra.mxu0 %v416_v2  ;;  %388 = vmatpush3.bf16.msra.mxu1 %v425_v6  ;;  %v338_v30 = vld [vmem:[%s580_s4] ss:$0 sm:$0xff]  ;;  %s315_s11 = sshll.u32 %s525_s2, 4  ;;  %s316_s11 = int_to_ptr.vmem [resolvable:$true] %s315_s11 }
  0x2d   :  { %369 = vmatprep.subr.bf16.mxu0 %v523_v0  ;;  %389 = vmatprep.subr.bf16.mxu1 %v523_v0  ;;  %s492_s12 = scalar_lea.vmem %s316_s11, 256  ;;  %p497_p2 = scmp.lt.s32.totalorder %s316_s11, %s316_s11 }
  0x2e   :  { %p493_p1 = scmp.ne.s32.totalorder %s316_s11, %s492_s12  ;;  %p498_p3 = scmp.lt.s32.totalorder %s492_s12, %s492_s12 }
  0x30   :  { %370 = vmatpush3.bf16.msra.mxu0 %v417_v3  ;;  %390 = vmatpush3.bf16.msra.mxu1 %v426_v8  ;;  %p499_p4 = por %p498_p3, %p497_p2 }
  0x31   :  { %371 = vmatprep.subr.bf16.mxu0 %v523_v0  ;;  %391 = vmatprep.subr.bf16.mxu1 %v523_v0 }
  0x32   :  { %p500_p5 = pnand %p499_p4, %p493_p1 }
  0x34   :  { %372 = vmatpush3.bf16.msra.mxu0 %v418_v5  ;;  %392 = vmatpush3.bf16.msra.mxu1 %v427_v10 }
  0x35   :  { %373 = vmatprep.subr.bf16.mxu0 %v523_v0  ;;  %393 = vmatprep.subr.bf16.mxu1 %v523_v0 }
  0x38   :  { %374 = vmatpush3.bf16.msra.mxu0 %v419_v7  ;;  %394 = vmatpush3.bf16.msra.mxu1 %v428_v12 }
  0x39   :  { %375 = vmatprep.subr.bf16.mxu0 %v523_v0  ;;  %395 = vmatprep.subr.bf16.mxu1 %v523_v0 }
  0x3c   :  { %376 = vmatpush3.bf16.msra.mxu0 %v420_v9  ;;  %396 = vmatpush3.bf16.msra.mxu1 %v429_v15 }
  0x3d   :  { %377 = vmatprep.subr.bf16.mxu0 %v523_v0  ;;  %397 = vmatprep.subr.bf16.mxu1 %v523_v0 }
  0x40   :  { %378 = vmatpush3.bf16.msra.mxu0 %v421_v11  ;;  %398 = vmatpush3.bf16.msra.mxu1 %v430_v16 }
  0x41   :  { %379 = vmatprep.subr.bf16.mxu0 %v523_v0  ;;  %399 = vmatprep.subr.bf16.mxu1 %v523_v0 }
  0x44   :  { %380 = vmatpush3.bf16.msra.mxu0 %v422_v13  ;;  %400 = vmatpush3.bf16.msra.mxu1 %v431_v17 }
  0x47   :  { %382 = vmatmul.mubr.bf16.vlgmr.msra.gmra.mxu0 %v423_v14 }
 0x107   :  { %v176_v19 = vpop.f32.mrf.mxu0 }
 0x108   :  { %v177_v20 = vadd.f32 %v328_v18, %v176_v19 }
 0x109   :  { %v383_v21 = vpop.f32.mrf.mxu0 }
 0x10a   :  { %v185_v23 = vmul.f32 0.01, %v177_v20  ;;  %vm183_vm1 = vcmp.gt.f32.partialorder %v177_v20, 0.0 }
 0x10b   :  { %v179_v22 = vpop.f32.mrf.mxu0 }
 0x10c   :  { %v180_v24 = vadd.f32 %v328_v18, %v179_v22  ;;  %v187_v27 = vsel %vm183_vm1, %v177_v20, %v185_v23 }
 0x10d   :  { %v384_v25 = vpop.f32.mrf.mxu0 }
 0x10e   :  { %vm184_vm2 = vcmp.gt.f32.partialorder %v180_v24, 0.0  ;;  %v186_v26 = vmul.f32 0.01, %v180_v24 }
 0x110   :  { %v188_v28 = vsel %vm184_vm2, %v180_v24, %v186_v26 }
 0x111   :  { %v189_v29 = vpack.c.bf16 %v188_v28, %v187_v27 }
 0x113   :  { %402 = vmatmul.mubr.bf16.vlgmr.msra.gmra.mxu1 %v189_v29 }
 0x1d3   :  { %v295_v31 = vpop.f32.mrf.mxu1 }
 0x1d4   :  { %v296_v32 = vadd.f32 %v338_v30, %v295_v31 }
 0x1d5   :  { %v403_v33 = vpop.f32.mrf.mxu1 }
 0x1d6   :  { %vm302_vm3 = vcmp.gt.f32.partialorder %v296_v32, 0.0  ;;  %v304_v34 = vmul.f32 0.01, %v296_v32 }
 0x1d7   :  { %v298_v35 = vpop.f32.mrf.mxu1 }
 0x1d8   :  { %v306_v36 = vsel %vm302_vm3, %v296_v32, %v304_v34  ;;  %v299_v37 = vadd.f32 %v338_v30, %v298_v35 }
 0x1d9   :  { %308 = vst [vmem:[#allocation8] sm:$0xff] %v306_v36  ;;  %v404_v38 = vpop.f32.mrf.mxu1 }
 0x1da   :  { %vm303_vm4 = vcmp.gt.f32.partialorder %v299_v37, 0.0  ;;  %v305_v39 = vmul.f32 0.01, %v299_v37 }
 0x1dc   :  { %v307_v40 = vsel %vm303_vm4, %v299_v37, %v305_v39 }
 0x1dd   :  { %309 = vst [vmem:[#allocation8 + $0x8] sm:$0xff] %v307_v40 }
 0x1de   :  { %503 = shalt.err (!%p500_p5)
}
 0x1df   :  { %s526_s4 = smov 128   ;;  %s527_s13 = smov 8  }
 0x1e0   :  { %321 = dma.vmem_to_hbm [thread:$0]  %s316_s11, 256, %s581_s5, [#allocation4], %s526_s4, %s526_s4, %s527_s13  }
 0x1e1   :  { %516 = dma.done.wait [#allocation4], 256  }
 0x1e2   :  { %517 = vsyncadd [#allocation4], 4294967040 }
 0x1e3   :  { %325 = vsyncpa [#allocation3], 1 }
 0x1e4   :  { %326 = vsyncpa [#allocation6], 1 }
 0x1e5   :  { %327 = vsyncpa [#allocation4], 1 }

</bundles_post_ra>
